<compile_context>
chip_gen: v7x
topology: tpu7x:2x2x1
jax: 0.10.0
libtpu: 0.0.40
codegen_flags: <defaults>
</compile_context>

<pallas_src>
import jax
import jax.numpy as jnp
from jax.experimental import pallas as pl
from jax.experimental.pallas import tpu as pltpu

SUBLANE = 8          # f32 sublane count -> batch tiles are multiples of 8
MAX_TILE_B = 1024    # per-tile x is B*n_obs*4B = ~16 KiB -> trivially inside VMEM

HIDDEN1 = 32
HIDDEN2 = 64


def _round_up(n, m):
    return ((n + m - 1) // m) * m


def _choose_tile_b(B):
    """Pick a batch tile (multiple of 8) and the padded batch size.

    - tiny batches (<= 8): one tile, no split.
    - mid-size batches: split into 2 tiles so v7x's two TensorCores both get work.
    - large batches: cap tiles at MAX_TILE_B.
    """
    b8 = _round_up(max(B, 1), SUBLANE)
    if b8 <= SUBLANE:
        tile_b = b8
    elif b8 <= 2 * MAX_TILE_B:
        tile_b = _round_up(pl.cdiv(b8, 2), SUBLANE)
    else:
        tile_b = MAX_TILE_B
    b_pad = _round_up(b8, tile_b)
    return tile_b, b_pad


def dqn_kernel(x_ref, w1_ref, b1_ref, w2_ref, b2_ref, w3_ref, b3_ref, out_ref):
    # layer1 + ReLU   ([tile_b, n_obs] @ [n_obs, 32])
    h1 = jnp.dot(x_ref[...], w1_ref[...], preferred_element_type=jnp.float32)
    h1 = jnp.maximum(h1 + b1_ref[...], 0.0)
    # layer2 + ReLU   ([tile_b, 32] @ [32, 64])
    h2 = jnp.dot(h1, w2_ref[...], preferred_element_type=jnp.float32)
    h2 = jnp.maximum(h2 + b2_ref[...], 0.0)
    # layer3 (no activation)   ([tile_b, 64] @ [64, n_actions])
    out = jnp.dot(h2, w3_ref[...], preferred_element_type=jnp.float32)
    out_ref[...] = (out + b3_ref[...]).astype(out_ref.dtype)


def dqn_forward(x, params):
    """x: [B, n_observations] float32. params: logical-shape weights/biases.
    Returns [B, n_actions] float32."""
    B, n_obs = x.shape
    n_actions = params["w3"].shape[1]

    tile_b, B_pad = _choose_tile_b(B)
    grid = (B_pad // tile_b,)

    # Pad only the batch dim (zero rows of width n_obs -> a few hundred bytes max).
    x_in = x if B_pad == B else jnp.zeros((B_pad, n_obs), x.dtype).at[:B].set(x)

    w1, b1, w2, b2, w3, b3 = (params["w1"], params["b1"], params["w2"],
                              params["b2"], params["w3"], params["b3"])

    # weights/biases: full-array blocks, constant index_map -> DMA'd once, VMEM-resident
    def resident(a):
        return pl.BlockSpec(a.shape, lambda i: (0,) * a.ndim)

    flops = 2 * B_pad * (n_obs * HIDDEN1 + HIDDEN1 * HIDDEN2 + HIDDEN2 * n_actions)
    param_elems = sum(int(p.size) for p in (w1, b1, w2, b2, w3, b3))
    bytes_accessed = 4 * (B_pad * n_obs + B_pad * n_actions + param_elems)

    out = pl.pallas_call(
        dqn_kernel,
        out_shape=jax.ShapeDtypeStruct((B_pad, n_actions), jnp.float32),
        grid=grid,
        in_specs=[
            # x streams per batch tile; last dim == full array dim (legal sub-128 block)
            pl.BlockSpec((tile_b, n_obs), lambda i: (i, 0)),
            resident(w1), resident(b1),
            resident(w2), resident(b2),
            resident(w3), resident(b3),
        ],
        # narrow, full-last-dim output block -> no dead-lane writeback, no post-slice
        out_specs=pl.BlockSpec((tile_b, n_actions), lambda i: (i, 0)),
        compiler_params=pltpu.CompilerParams(
            dimension_semantics=("parallel",),   # shards batch tiles across TCs on v7x
        ),
        cost_estimate=pl.CostEstimate(
            flops=flops, bytes_accessed=bytes_accessed, transcendentals=0),
    )(x_in, w1, b1, w2, b2, w3, b3)

    return out if B_pad == B else out[:B]


def init_dqn_params(key, n_observations, n_actions):
    """nn.Linear-style init U(-1/sqrt(fan_in), 1/sqrt(fan_in)), stored transposed
    ([in, out]) at logical shapes; biases stored as [1, out]."""
    dims = [(n_observations, HIDDEN1), (HIDDEN1, HIDDEN2), (HIDDEN2, n_actions)]
    params = {}
    for i, (fan_in, fan_out) in enumerate(dims, start=1):
        key, kw, kb = jax.random.split(key, 3)
        bound = 1.0 / (fan_in ** 0.5)
        params[f"w{i}"] = jax.random.uniform(
            kw, (fan_in, fan_out), jnp.float32, -bound, bound)
        params[f"b{i}"] = jax.random.uniform(
            kb, (1, fan_out), jnp.float32, -bound, bound)
    return params


def dqn_reference(x, params):
    """Pure-JAX reference."""
    h1 = jnp.maximum(x @ params["w1"] + params["b1"], 0.0)
    h2 = jnp.maximum(h1 @ params["w2"] + params["b2"], 0.0)
    return h2 @ params["w3"] + params["b3"]


if __name__ == "__main__":
    n_observations = 4   # e.g. CartPole observation size
    n_actions = 2
    batch = 2

    key = jax.random.PRNGKey(0)
    key, kx = jax.random.split(key)
    x = jax.random.normal(kx, (batch, n_observations), jnp.float32)
    params = init_dqn_params(key, n_observations, n_actions)

    out = dqn_forward(x, params)
    out = jax.block_until_ready(out)
    ref = dqn_reference(x, params)
    assert out.shape == (batch, n_actions)
    assert jnp.allclose(out, ref, atol=1e-5, rtol=1e-5), "mismatch vs reference (small batch)"

    # also exercise the multi-tile (grid > 1) + batch-padding path with a replay-size batch
    key, kx2 = jax.random.split(key)
    x2 = jax.random.normal(kx2, (40, n_observations), jnp.float32)
    out2 = jax.block_until_ready(dqn_forward(x2, params))
    ref2 = dqn_reference(x2, params)
    assert out2.shape == (40, n_actions)
    assert jnp.allclose(out2, ref2, atol=1e-5, rtol=1e-5), "mismatch vs reference (batch=40)"

    print("KERNEL_OK")
</pallas_src>

<mosaic_0001>
module attributes {stable_mosaic.version = 11 : i64} {
  func.func @dqn_kernel(%arg0: i32, %arg1: memref<8x4xf32, #tpu.memory_space<vmem>>, %arg2: memref<4x32xf32, #tpu.memory_space<vmem>>, %arg3: memref<1x32xf32, #tpu.memory_space<vmem>>, %arg4: memref<32x64xf32, #tpu.memory_space<vmem>>, %arg5: memref<1x64xf32, #tpu.memory_space<vmem>>, %arg6: memref<64x2xf32, #tpu.memory_space<vmem>>, %arg7: memref<1x2xf32, #tpu.memory_space<vmem>>, %arg8: memref<8x2xf32, #tpu.memory_space<vmem>>) attributes {dimension_semantics = [#tpu.dimension_semantics<parallel>], iteration_bounds = array<i64: 1>, scalar_prefetch = 0 : i64, scratch_operands = 0 : i64, tpu.core_type = #tpu.core_type<tc>, window_params = [{transform_indices = @transform_0, window_bounds = array<i64: 8, 4>}, {pipeline_mode = #tpu.pipeline_mode<synchronous>, transform_indices = @transform_1, window_bounds = array<i64: 4, 32>}, {pipeline_mode = #tpu.pipeline_mode<synchronous>, transform_indices = @transform_2, window_bounds = array<i64: 1, 32>}, {pipeline_mode = #tpu.pipeline_mode<synchronous>, transform_indices = @transform_3, window_bounds = array<i64: 32, 64>}, {pipeline_mode = #tpu.pipeline_mode<synchronous>, transform_indices = @transform_4, window_bounds = array<i64: 1, 64>}, {pipeline_mode = #tpu.pipeline_mode<synchronous>, transform_indices = @transform_5, window_bounds = array<i64: 64, 2>}, {pipeline_mode = #tpu.pipeline_mode<synchronous>, transform_indices = @transform_6, window_bounds = array<i64: 1, 2>}, {transform_indices = @transform_7, window_bounds = array<i64: 8, 2>}]} {
    %c0 = arith.constant 0 : index
    %c0_0 = arith.constant 0 : index
    %0 = vector.load %arg1[%c0, %c0_0] : memref<8x4xf32, #tpu.memory_space<vmem>>, vector<8x4xf32>
    %c0_1 = arith.constant 0 : index
    %c0_2 = arith.constant 0 : index
    %1 = vector.load %arg2[%c0_1, %c0_2] : memref<4x32xf32, #tpu.memory_space<vmem>>, vector<4x32xf32>
    %cst = arith.constant dense<0.000000e+00> : vector<8x32xf32>
    %2 = tpu.matmul %0, %1, %cst {dimension_numbers = #tpu.dot_dimension_numbers<[1], [0], [0], [1], [0, 0, 1, 1], [], []>} : vector<8x4xf32>, vector<4x32xf32>, vector<8x32xf32> -> vector<8x32xf32>
    %c0_3 = arith.constant 0 : index
    %c0_4 = arith.constant 0 : index
    %3 = vector.load %arg3[%c0_3, %c0_4] : memref<1x32xf32, #tpu.memory_space<vmem>>, vector<1x32xf32>
    %4 = vector.broadcast %3 : vector<1x32xf32> to vector<8x32xf32>
    %5 = arith.addf %2, %4 : vector<8x32xf32>
    %cst_5 = arith.constant 0.000000e+00 : f32
    %6 = vector.broadcast %cst_5 : f32 to vector<8x32xf32>
    %7 = arith.maximumf %5, %6 : vector<8x32xf32>
    %c0_6 = arith.constant 0 : index
    %c0_7 = arith.constant 0 : index
    %8 = vector.load %arg4[%c0_6, %c0_7] : memref<32x64xf32, #tpu.memory_space<vmem>>, vector<32x64xf32>
    %cst_8 = arith.constant dense<0.000000e+00> : vector<8x64xf32>
    %9 = tpu.matmul %7, %8, %cst_8 {dimension_numbers = #tpu.dot_dimension_numbers<[1], [0], [0], [1], [0, 0, 1, 1], [], []>} : vector<8x32xf32>, vector<32x64xf32>, vector<8x64xf32> -> vector<8x64xf32>
    %c0_9 = arith.constant 0 : index
    %c0_10 = arith.constant 0 : index
    %10 = vector.load %arg5[%c0_9, %c0_10] : memref<1x64xf32, #tpu.memory_space<vmem>>, vector<1x64xf32>
    %11 = vector.broadcast %10 : vector<1x64xf32> to vector<8x64xf32>
    %12 = arith.addf %9, %11 : vector<8x64xf32>
    %cst_11 = arith.constant 0.000000e+00 : f32
    %13 = vector.broadcast %cst_11 : f32 to vector<8x64xf32>
    %14 = arith.maximumf %12, %13 : vector<8x64xf32>
    %c0_12 = arith.constant 0 : index
    %c0_13 = arith.constant 0 : index
    %15 = vector.load %arg6[%c0_12, %c0_13] : memref<64x2xf32, #tpu.memory_space<vmem>>, vector<64x2xf32>
    %cst_14 = arith.constant dense<0.000000e+00> : vector<8x2xf32>
    %16 = tpu.matmul %14, %15, %cst_14 {dimension_numbers = #tpu.dot_dimension_numbers<[1], [0], [0], [1], [0, 0, 1, 1], [], []>} : vector<8x64xf32>, vector<64x2xf32>, vector<8x2xf32> -> vector<8x2xf32>
    %c0_15 = arith.constant 0 : index
    %c0_16 = arith.constant 0 : index
    %17 = vector.load %arg7[%c0_15, %c0_16] : memref<1x2xf32, #tpu.memory_space<vmem>>, vector<1x2xf32>
    %18 = vector.broadcast %17 : vector<1x2xf32> to vector<8x2xf32>
    %19 = arith.addf %16, %18 : vector<8x2xf32>
    %c0_17 = arith.constant 0 : index
    %c0_18 = arith.constant 0 : index
    %20 = vector.load %arg8[%c0_17, %c0_18] : memref<8x2xf32, #tpu.memory_space<vmem>>, vector<8x2xf32>
    tpu.vector_store %arg8[%c0_17, %c0_18], %19 {strides = array<i32>} : memref<8x2xf32, #tpu.memory_space<vmem>>, vector<8x2xf32>,
    return
  }
  func.func @transform_0(%arg0: i32) -> (i32, i32) {
    %c0_i32 = arith.constant 0 : i32
    %c0_i32_0 = arith.constant 0 : i32
    return %arg0, %c0_i32 : i32, i32
  }
  func.func @transform_1(%arg0: i32) -> (i32, i32) {
    %c0_i32 = arith.constant 0 : i32
    %c0_i32_0 = arith.constant 0 : i32
    %c0_i32_1 = arith.constant 0 : i32
    return %c0_i32, %c0_i32_0 : i32, i32
  }
  func.func @transform_2(%arg0: i32) -> (i32, i32) {
    %c0_i32 = arith.constant 0 : i32
    %c0_i32_0 = arith.constant 0 : i32
    %c0_i32_1 = arith.constant 0 : i32
    return %c0_i32, %c0_i32_0 : i32, i32
  }
  func.func @transform_3(%arg0: i32) -> (i32, i32) {
    %c0_i32 = arith.constant 0 : i32
    %c0_i32_0 = arith.constant 0 : i32
    %c0_i32_1 = arith.constant 0 : i32
    return %c0_i32, %c0_i32_0 : i32, i32
  }
  func.func @transform_4(%arg0: i32) -> (i32, i32) {
    %c0_i32 = arith.constant 0 : i32
    %c0_i32_0 = arith.constant 0 : i32
    %c0_i32_1 = arith.constant 0 : i32
    return %c0_i32, %c0_i32_0 : i32, i32
  }
  func.func @transform_5(%arg0: i32) -> (i32, i32) {
    %c0_i32 = arith.constant 0 : i32
    %c0_i32_0 = arith.constant 0 : i32
    %c0_i32_1 = arith.constant 0 : i32
    return %c0_i32, %c0_i32_0 : i32, i32
  }
  func.func @transform_6(%arg0: i32) -> (i32, i32) {
    %c0_i32 = arith.constant 0 : i32
    %c0_i32_0 = arith.constant 0 : i32
    %c0_i32_1 = arith.constant 0 : i32
    return %c0_i32, %c0_i32_0 : i32, i32
  }
  func.func @transform_7(%arg0: i32) -> (i32, i32) {
    %c0_i32 = arith.constant 0 : i32
    %c0_i32_0 = arith.constant 0 : i32
    return %arg0, %c0_i32 : i32, i32
  }
}

</mosaic_0001>

<bundles_post_ra>
// kernel: tpu_custom_call.1
= control target key start
LH: loop header
LB: loop body
LE: loop exit
PB: predicated region body
PF: predicated region fallthrough
CT: control target
= control target key end

     0   :  { %vm39_vm0 = vcmask 1043456   ;;  %vm35_vm1 = vcmask 31744   ;;  %v374_v0 = vmov 0.0   ;;  %vm375_vm2 = vmmov 0   ;;  %s471_s1 = inlined_call_operand.vmem [shape: f32[4,32], index: 1, kind: input, shape index: {}]   ;;  %s472_s0 = inlined_call_operand.vmem [shape: f32[8,4], index: 0, kind: input, shape index: {}]   ;;  %s473_s3 = inlined_call_operand.vmem [shape: f32[32,64], index: 3, kind: input, shape index: {}]   ;;  %s474_s5 = inlined_call_operand.vmem [shape: f32[64,2], index: 5, kind: input, shape index: {}]   ;;  %s475_s2 = inlined_call_operand.vmem [shape: f32[1,32], index: 2, kind: input, shape index: {}]   ;;  %s476_s4 = inlined_call_operand.vmem [shape: f32[1,64], index: 4, kind: input, shape index: {}]   ;;  %s477_s6 = inlined_call_operand.vmem [shape: f32[1,2], index: 6, kind: input, shape index: {}]   ;;  %s478_s7 = inlined_call_operand.vmem [shape: f32[8,2], index: 7, kind: output, shape index: {}]  }
   0x1   :  { %318 = vmatprep.subr.mxu1 %v374_v0  ;;  %v27_v1 = vld [vmem:[%s471_s1] sm:$0xf]  ;;  %320 = vmatprep.mubr.msk.f32.mxu1 %vm375_vm2, %v374_v0  ;;  %v115_v4 = vld [vmem:[%s473_s3 + $0x8] sm:$0xff]  ;;  %v376_v5 = vmov 0.0|0.0   ;;  %v116_v7 = vld [vmem:[%s473_s3 + $0x10] sm:$0xff]  ;;  %vm125_vm3 = vcmask 261120  }
   0x2   :  { %v26_v2 = vld [vmem:[%s472_s0] sm:$0xff]  ;;  %319 = vmatpush3.msk.msra.mxu1 %vm39_vm0, %v27_v1  ;;  %359 = vmatprep.subr.bf16.mxu0 %v376_v5  ;;  %v117_v8 = vld [vmem:[%s473_s3 + $0x18] sm:$0xff]  ;;  %v201_v11 = vld [vmem:[%s474_s5 + $0x8] sm:$0xff]  ;;  %vm215_vm4 = vcmask 523264   ;;  %vm289_vm5 = vcmask 15360  }
   0x3   :  { %v114_v3 = vld [vmem:[%s473_s3] sm:$0xff]  ;;  %321 = vmatmul.mubr.msk.f32.vlgmr.msra.gmra.mrb[0].mxu1 %vm35_vm1, %v26_v2  ;;  %353 = vmatprep.subr.bf16.mxu1 %v376_v5  ;;  %v357_v9 = vpack.c.bf16 %v117_v8, %v116_v7  ;;  %v202_v12 = vld [vmem:[%s474_s5 + $0x10] sm:$0xff]  ;;  %v203_v14 = vld [vmem:[%s474_s5 + $0x18] sm:$0xff] }
   0x4   :  { %v354_v6 = vpack.c.bf16 %v115_v4, %v114_v3  ;;  %331 = vmatprep.mubr.msk.f32.mxu1 %vm375_vm2, %v374_v0  ;;  %350 = vmatprep.mubr.msk.f32.mxu0 %vm375_vm2, %v374_v0  ;;  %v200_v10 = vld [vmem:[%s474_s5] sm:$0xff]  ;;  %v363_v15 = vpack.c.bf16 %v203_v14, %v202_v12  ;;  %v205_v17 = vld [vmem:[%s474_s5 + $0x28] sm:$0xff]  ;;  %v206_v24 = vld [vmem:[%s474_s5 + $0x30] sm:$0xff] }
   0x5   :  { %v360_v13 = vpack.c.bf16 %v201_v11, %v200_v10  ;;  %v204_v16 = vld [vmem:[%s474_s5 + $0x20] sm:$0xff]  ;;  %v207_v25 = vld [vmem:[%s474_s5 + $0x38] sm:$0xff] }
   0x6   :  { %355 = vmatpush3.bf16.msra.mxu1 %v354_v6  ;;  %v366_v18 = vpack.c.bf16 %v205_v17, %v204_v16  ;;  %v295_v19 = vld [vmem:[%s475_s2] ss:$0 sm:$0xff]  ;;  %v369_v26 = vpack.c.bf16 %v207_v25, %v206_v24 }
   0x7   :  { %356 = vmatprep.subr.bf16.mxu1 %v376_v5  ;;  %361 = vmatpush3.bf16.msra.mxu0 %v360_v13  ;;  %v298_v27 = vld [vmem:[%s476_s4] ss:$0 sm:$0xff] }
   0x8   :  { %362 = vmatprep.subr.bf16.mxu0 %v376_v5  ;;  %v300_v32 = vld [vmem:[%s477_s6] ss:$0 sm:$0xff] }
   0xa   :  { %358 = vmatpush3.bf16.msra.mxu1 %v357_v9 }
   0xb   :  { %364 = vmatpush3.bf16.msra.mxu0 %v363_v15 }
   0xc   :  { %365 = vmatprep.subr.bf16.mxu0 %v376_v5 }
   0xf   :  { %367 = vmatpush3.bf16.msra.mxu0 %v366_v18 }
  0x10   :  { %368 = vmatprep.subr.bf16.mxu0 %v376_v5 }
  0x13   :  { %370 = vmatpush3.bf16.msra.mxu0 %v369_v26 }
  0xd6   :  { %v109_v20 = vpop.f32.mrb[0].mxu1 }
  0xd7   :  { %v110_v21 = vadd.f32 %v295_v19, %v109_v20  ;;  %v322_v22 = vpop.f32.mrb[1].mxu1 }
  0xd9   :  { %v113_v23 = vmax.f32 %v110_v21, 0.0 }
  0xdb   :  { %332 = vmatmul.mubr.msk.f32.vlgmr.msra.gmra.mrb[2].mxu1 %vm125_vm3, %v113_v23 }
 0x1ae   :  { %v195_v28 = vpop.f32.mrb[2].mxu1 }
 0x1af   :  { %v196_v29 = vadd.f32 %v298_v27, %v195_v28  ;;  %v333_v30 = vpop.f32.mrb[3].mxu1 }
 0x1b1   :  { %v199_v31 = vmax.f32 %v196_v29, 0.0 }
 0x1b3   :  { %351 = vmatmul.mubr.msk.f32.vlgmr.msra.gmra.mrb[0].mxu0 %vm215_vm4, %v199_v31 }
 0x286   :  { %v285_v33 = vpop.f32.mrb[0].mxu0 }
 0x287   :  { %v286_v34 = vadd.f32 %v300_v32, %v285_v33  ;;  %v352_v35 = vpop.f32.mrb[1].mxu0 }
 0x289   :  { %290 = vst.msk [vmem:[%s478_s7] sm:$0xff] %vm289_vm5, %v286_v34 }

</bundles_post_ra>
